<compile_context>
chip_gen: v7x
topology: tpu7x:2x2x1
jax: 0.10.0
libtpu: 0.0.40
codegen_flags: <defaults>
</compile_context>

<pallas_src>
import functools

import jax
import jax.numpy as jnp
from jax.experimental import pallas as pl
from jax.experimental.pallas import tpu as pltpu

EPS = 1e-5  # torch.nn.LayerNorm default

# Head order matches the forward pass read order of feat[:, i].
HEAD_NAMES = [
    "technique_logits",  # feat[:, 0]
    "language_logits",   # feat[:, 1]
    "gender_logits",     # feat[:, 2]
    "emotion_logits",    # feat[:, 3]
    "method_logits",     # feat[:, 4]
    "pace_logits",       # feat[:, 5]
    "range_logits",      # feat[:, 6]
]
HEAD_DIMS = [10, 9, 2, 4, 2, 3, 3]  # num_*_tokens defaults from the module
HEAD_OFFS = [sum(HEAD_DIMS[:i]) for i in range(len(HEAD_DIMS))]  # [0,10,19,21,25,27,30]
NUM_TOKENS = 7
N_PAD = 128  # single lane-dense output slab (33 real columns, rest zero weight/bias)


def style_predictor_kernel(feat_ref, s_ref, st_ref, gamma_ref, beta_ref,
                           w_ref, b_ref, out_ref):
    # feat_ref : (TB, 7H)   bf16/f32 input tile (contiguous DMA)
    # s_ref    : (7H, 7)    f32  per-feature -> token indicator
    # st_ref   : (7, 7H)    f32  token -> per-feature broadcast, scaled by 1/H
    # gamma/beta : (1, 7H)  f32  flattened LayerNorm affine params
    # w_ref    : (7H, 128)  bf16 packed head weights (zero outside own token/cols)
    # b_ref    : (1, 128)   f32  packed head bias
    # out_ref  : (TB, 128)  bf16/f32 packed logits slab
    x = feat_ref[...].astype(jnp.float32)                                  # (TB, 7H)

    # Per-(row, token) mean, broadcast back to all of that token's features.
    seg_sum = jnp.dot(x, s_ref[...], preferred_element_type=jnp.float32)   # (TB, 7)
    mean_b = jnp.dot(seg_sum, st_ref[...],
                     preferred_element_type=jnp.float32)                   # (TB, 7H)
    centered = x - mean_b

    # Per-(row, token) biased variance (torch LayerNorm), broadcast back.
    var_sum = jnp.dot(centered * centered, s_ref[...],
                      preferred_element_type=jnp.float32)                  # (TB, 7)
    var_b = jnp.dot(var_sum, st_ref[...],
                    preferred_element_type=jnp.float32)                    # (TB, 7H)

    xn = centered * jax.lax.rsqrt(var_b + EPS)
    xn = xn * gamma_ref[...] + beta_ref[...]

    # One fused lane-dense head matmul: bf16 operands, f32 accumulation.
    acc = jnp.dot(xn.astype(jnp.bfloat16), w_ref[...],
                  preferred_element_type=jnp.float32)                      # (TB, 128)
    out_ref[...] = (acc + b_ref[...]).astype(out_ref.dtype)


def _vmem_budgets():
    """(vmem_limit_bytes, tile_budget_bytes), TPU-generation dependent."""
    cap = None
    try:
        info = pltpu.get_tpu_info()
        for attr in ("vmem_capacity_bytes", "vmem_bytes", "vmem_size_bytes"):
            cap = getattr(info, attr, None)
            if cap:
                break
    except Exception:
        cap = None
    if cap and cap >= (100 << 20):        # v5e / v6e class: 128 MiB VMEM per core
        return 96 << 20, 64 << 20
    return 40 << 20, 20 << 20             # v7x (64 MiB physical) or unknown: conservative


def _pick_batch_tile(hidden, in_bytes, out_bytes, budget_bytes):
    """Batch tile sized against double-buffered tiles PLUS in-kernel f32 temporaries."""
    F = NUM_TOKENS * hidden
    per_row = (2 * F * in_bytes            # feat tile, double-buffered
               + 2 * N_PAD * out_bytes     # out tile, double-buffered
               + 6 * F * 4                 # x, mean_b, centered, var_b, xn, xn_bf16 temporaries
               + N_PAD * 4)                # f32 accumulator
    fixed = (2 * 2 * F * NUM_TOKENS * 4    # S and S^T/H (resident)
             + 2 * F * N_PAD * 2           # packed bf16 head weights
             + 2 * 2 * F * 4               # gamma / beta
             + 2 * N_PAD * 4)              # bias
    tb = (max(budget_bytes - fixed, 0) // max(per_row, 1)) // 8 * 8
    return int(max(8, min(tb, 4096)))


def style_predictor_forward(feat, gamma, beta, w, b, tb=None, out_dtype=None):
    """feat: [B, 7, H] (bf16 or f32).  Returns dict of per-head logits."""
    B, T, H = feat.shape
    assert T == NUM_TOKENS
    F = T * H

    # Free, contiguous reshape (no data movement) -> lane-dense (B, 7H) layout.
    feat2d = feat.reshape(B, F)
    gamma2d = gamma.reshape(1, F).astype(jnp.float32)
    beta2d = beta.reshape(1, F).astype(jnp.float32)

    # Segment-indicator matrices for the in-kernel per-token LayerNorm stats.
    tok = jnp.arange(NUM_TOKENS, dtype=jnp.int32)
    col_tok = jnp.repeat(tok, H)                                         # (7H,)
    seg = (col_tok[:, None] == tok[None, :]).astype(jnp.float32)         # (7H, 7)
    seg_bcast = seg.T / float(H)                                         # (7, 7H)

    if out_dtype is None:
        # Output slab carries only 33 real columns; halve its writeback for small H.
        out_dtype = jnp.bfloat16 if H < 512 else jnp.float32

    vmem_limit, tile_budget = _vmem_budgets()
    in_bytes = jnp.dtype(feat.dtype).itemsize
    out_bytes = jnp.dtype(out_dtype).itemsize
    if tb is None:
        tb = _pick_batch_tile(H, in_bytes, out_bytes, tile_budget)
    tb = int(tb)
    if tb >= B:
        tb = B                               # single (possibly <8-row) full tile
    else:
        tb = max(8, (tb // 8) * 8)           # keep the (8,128) block constraint
    grid = (pl.cdiv(B, tb),)

    out = pl.pallas_call(
        style_predictor_kernel,
        out_shape=jax.ShapeDtypeStruct((B, N_PAD), out_dtype),
        grid_spec=pltpu.PrefetchScalarGridSpec(
            num_scalar_prefetch=0,
            grid=grid,
            in_specs=[
                pl.BlockSpec((tb, F), lambda i: (i, 0)),            # feat tile
                pl.BlockSpec((F, NUM_TOKENS), lambda i: (0, 0)),    # S        (resident)
                pl.BlockSpec((NUM_TOKENS, F), lambda i: (0, 0)),    # S^T / H  (resident)
                pl.BlockSpec((1, F), lambda i: (0, 0)),             # gamma    (resident)
                pl.BlockSpec((1, F), lambda i: (0, 0)),             # beta     (resident)
                pl.BlockSpec((F, N_PAD), lambda i: (0, 0)),         # W bf16   (resident)
                pl.BlockSpec((1, N_PAD), lambda i: (0, 0)),         # bias     (resident)
            ],
            out_specs=pl.BlockSpec((tb, N_PAD), lambda i: (i, 0)),
        ),
        compiler_params=pltpu.CompilerParams(
            dimension_semantics=("parallel",),   # megacore sharding on multi-TC parts
            vmem_limit_bytes=vmem_limit,
        ),
    )(feat2d, seg, seg_bcast, gamma2d, beta2d, w, b)

    return {
        name: out[:, off:off + n]
        for name, off, n in zip(HEAD_NAMES, HEAD_OFFS, HEAD_DIMS)
    }


def style_predictor_reference(feat, gamma, beta, w, b):
    """Pure-JAX f32 reference (same packed params) for correctness checking."""
    x = feat.astype(jnp.float32)                              # (B, 7, H)
    mean = x.mean(-1, keepdims=True)
    var = jnp.square(x - mean).mean(-1, keepdims=True)
    xn = (x - mean) * jax.lax.rsqrt(var + EPS)
    xn = xn * gamma[None] + beta[None]
    B = x.shape[0]
    logits = xn.reshape(B, -1) @ w.astype(jnp.float32) + b[0]
    return {
        name: logits[:, off:off + n]
        for name, off, n in zip(HEAD_NAMES, HEAD_OFFS, HEAD_DIMS)
    }


def init_params(key, hidden_size):
    """Matches the module's reset_parameters: kaiming_normal_(fan_in) head weights
    (std = sqrt(2/H)), zero bias, LayerNorm gamma=1 / beta=0.  Head weights are
    packed permanently into one [7*H, 128] bf16 matrix: token t's rows are
    t*H:(t+1)*H and its head occupies a fixed column offset; everything else is 0,
    which makes the single K=7H matmul exactly equal to the 7 separate heads."""
    gamma = jnp.ones((NUM_TOKENS, hidden_size), jnp.float32)
    beta = jnp.zeros((NUM_TOKENS, hidden_size), jnp.float32)

    w = jnp.zeros((NUM_TOKENS * hidden_size, N_PAD), jnp.float32)
    b = jnp.zeros((1, N_PAD), jnp.float32)

    std = (2.0 / hidden_size) ** 0.5
    keys = jax.random.split(key, NUM_TOKENS)
    for i, (off, n_out) in enumerate(zip(HEAD_OFFS, HEAD_DIMS)):
        # torch Linear weight is [n_out, H]; we store its transpose [H, n_out].
        w_i = std * jax.random.normal(keys[i], (hidden_size, n_out), jnp.float32)
        w = w.at[i * hidden_size:(i + 1) * hidden_size, off:off + n_out].set(w_i)
    return gamma, beta, w.astype(jnp.bfloat16), b


def _check(got, ref, tol=5e-2):
    for name in HEAD_NAMES:
        err = float(jnp.max(jnp.abs(got[name].astype(jnp.float32) - ref[name])))
        assert err < tol, (name, err)


if __name__ == "__main__":
    key = jax.random.PRNGKey(0)
    k_feat, k_params, k_feat2 = jax.random.split(key, 3)

    H = 32  # hidden_size
    gamma, beta, w, b = init_params(k_params, H)

    # Small shape consistent with the module (single grid step); feat in bf16.
    B = 2
    feat = jax.random.normal(k_feat, (B, NUM_TOKENS, H), jnp.float32).astype(jnp.bfloat16)
    ret = jax.block_until_ready(jax.jit(style_predictor_forward)(feat, gamma, beta, w, b))
    for name, n in zip(HEAD_NAMES, HEAD_DIMS):
        assert ret[name].shape == (B, n), (name, ret[name].shape)
    _check(ret, style_predictor_reference(feat, gamma, beta, w, b))

    # Exercise the batch grid (2 tiles, last one partial) with the same params.
    B2 = 10
    feat2 = jax.random.normal(k_feat2, (B2, NUM_TOKENS, H), jnp.float32).astype(jnp.bfloat16)
    fwd2 = jax.jit(functools.partial(style_predictor_forward, tb=8))
    ret2 = jax.block_until_ready(fwd2(feat2, gamma, beta, w, b))
    for name, n in zip(HEAD_NAMES, HEAD_DIMS):
        assert ret2[name].shape == (B2, n), (name, ret2[name].shape)
    _check(ret2, style_predictor_reference(feat2, gamma, beta, w, b))

    print("KERNEL_OK")
</pallas_src>

<mosaic_0001>
module attributes {stable_mosaic.version = 11 : i64} {
  func.func @style_predictor_kernel(%arg0: i32, %arg1: memref<2x224xbf16, #tpu.memory_space<vmem>>, %arg2: memref<224x7xf32, #tpu.memory_space<vmem>>, %arg3: memref<7x224xf32, #tpu.memory_space<vmem>>, %arg4: memref<1x224xf32, #tpu.memory_space<vmem>>, %arg5: memref<1x224xf32, #tpu.memory_space<vmem>>, %arg6: memref<224x128xbf16, #tpu.memory_space<vmem>>, %arg7: memref<1x128xf32, #tpu.memory_space<vmem>>, %arg8: memref<2x128xbf16, #tpu.memory_space<vmem>>) attributes {dimension_semantics = [#tpu.dimension_semantics<parallel>], iteration_bounds = array<i64: 1>, scalar_prefetch = 0 : i64, scratch_operands = 0 : i64, tpu.core_type = #tpu.core_type<tc>, window_params = [{transform_indices = @transform_0, window_bounds = array<i64: 2, 224>}, {pipeline_mode = #tpu.pipeline_mode<synchronous>, transform_indices = @transform_1, window_bounds = array<i64: 224, 7>}, {pipeline_mode = #tpu.pipeline_mode<synchronous>, transform_indices = @transform_2, window_bounds = array<i64: 7, 224>}, {pipeline_mode = #tpu.pipeline_mode<synchronous>, transform_indices = @transform_3, window_bounds = array<i64: 1, 224>}, {pipeline_mode = #tpu.pipeline_mode<synchronous>, transform_indices = @transform_4, window_bounds = array<i64: 1, 224>}, {pipeline_mode = #tpu.pipeline_mode<synchronous>, transform_indices = @transform_5, window_bounds = array<i64: 224, 128>}, {pipeline_mode = #tpu.pipeline_mode<synchronous>, transform_indices = @transform_6, window_bounds = array<i64: 1, 128>}, {transform_indices = @transform_7, window_bounds = array<i64: 2, 128>}]} {
    %c0 = arith.constant 0 : index
    %c0_0 = arith.constant 0 : index
    %0 = vector.load %arg1[%c0, %c0_0] : memref<2x224xbf16, #tpu.memory_space<vmem>>, vector<2x224xbf16>
    %1 = arith.extf %0 : vector<2x224xbf16> to vector<2x224xf32>
    %c0_1 = arith.constant 0 : index
    %c0_2 = arith.constant 0 : index
    %2 = vector.load %arg2[%c0_1, %c0_2] : memref<224x7xf32, #tpu.memory_space<vmem>>, vector<224x7xf32>
    %cst = arith.constant dense<0.000000e+00> : vector<2x7xf32>
    %3 = tpu.matmul %1, %2, %cst {dimension_numbers = #tpu.dot_dimension_numbers<[1], [0], [0], [1], [0, 0, 1, 1], [], []>} : vector<2x224xf32>, vector<224x7xf32>, vector<2x7xf32> -> vector<2x7xf32>
    %c0_3 = arith.constant 0 : index
    %c0_4 = arith.constant 0 : index
    %4 = vector.load %arg3[%c0_3, %c0_4] : memref<7x224xf32, #tpu.memory_space<vmem>>, vector<7x224xf32>
    %cst_5 = arith.constant dense<0.000000e+00> : vector<2x224xf32>
    %5 = tpu.matmul %3, %4, %cst_5 {dimension_numbers = #tpu.dot_dimension_numbers<[1], [0], [0], [1], [0, 0, 1, 1], [], []>} : vector<2x7xf32>, vector<7x224xf32>, vector<2x224xf32> -> vector<2x224xf32>
    %6 = arith.subf %1, %5 : vector<2x224xf32>
    %7 = arith.mulf %6, %6 : vector<2x224xf32>
    %c0_6 = arith.constant 0 : index
    %c0_7 = arith.constant 0 : index
    %8 = vector.load %arg2[%c0_6, %c0_7] : memref<224x7xf32, #tpu.memory_space<vmem>>, vector<224x7xf32>
    %cst_8 = arith.constant dense<0.000000e+00> : vector<2x7xf32>
    %9 = tpu.matmul %7, %8, %cst_8 {dimension_numbers = #tpu.dot_dimension_numbers<[1], [0], [0], [1], [0, 0, 1, 1], [], []>} : vector<2x224xf32>, vector<224x7xf32>, vector<2x7xf32> -> vector<2x7xf32>
    %c0_9 = arith.constant 0 : index
    %c0_10 = arith.constant 0 : index
    %10 = vector.load %arg3[%c0_9, %c0_10] : memref<7x224xf32, #tpu.memory_space<vmem>>, vector<7x224xf32>
    %cst_11 = arith.constant dense<0.000000e+00> : vector<2x224xf32>
    %11 = tpu.matmul %9, %10, %cst_11 {dimension_numbers = #tpu.dot_dimension_numbers<[1], [0], [0], [1], [0, 0, 1, 1], [], []>} : vector<2x7xf32>, vector<7x224xf32>, vector<2x224xf32> -> vector<2x224xf32>
    %cst_12 = arith.constant 9.99999974E-6 : f32
    %12 = vector.broadcast %cst_12 : f32 to vector<2x224xf32>
    %13 = arith.addf %11, %12 : vector<2x224xf32>
    %14 = math.rsqrt %13 : vector<2x224xf32>
    %15 = arith.mulf %6, %14 : vector<2x224xf32>
    %c0_13 = arith.constant 0 : index
    %c0_14 = arith.constant 0 : index
    %16 = vector.load %arg4[%c0_13, %c0_14] : memref<1x224xf32, #tpu.memory_space<vmem>>, vector<1x224xf32>
    %17 = vector.broadcast %16 : vector<1x224xf32> to vector<2x224xf32>
    %18 = arith.mulf %15, %17 : vector<2x224xf32>
    %c0_15 = arith.constant 0 : index
    %c0_16 = arith.constant 0 : index
    %19 = vector.load %arg5[%c0_15, %c0_16] : memref<1x224xf32, #tpu.memory_space<vmem>>, vector<1x224xf32>
    %20 = vector.broadcast %19 : vector<1x224xf32> to vector<2x224xf32>
    %21 = arith.addf %18, %20 : vector<2x224xf32>
    %22 = arith.truncf %21 : vector<2x224xf32> to vector<2x224xbf16>
    %c0_17 = arith.constant 0 : index
    %c0_18 = arith.constant 0 : index
    %23 = vector.load %arg6[%c0_17, %c0_18] : memref<224x128xbf16, #tpu.memory_space<vmem>>, vector<224x128xbf16>
    %cst_19 = arith.constant dense<0.000000e+00> : vector<2x128xf32>
    %24 = tpu.matmul %22, %23, %cst_19 {dimension_numbers = #tpu.dot_dimension_numbers<[1], [0], [0], [1], [0, 0, 1, 1], [], []>} : vector<2x224xbf16>, vector<224x128xbf16>, vector<2x128xf32> -> vector<2x128xf32>
    %c0_20 = arith.constant 0 : index
    %c0_21 = arith.constant 0 : index
    %25 = vector.load %arg7[%c0_20, %c0_21] : memref<1x128xf32, #tpu.memory_space<vmem>>, vector<1x128xf32>
    %26 = vector.broadcast %25 : vector<1x128xf32> to vector<2x128xf32>
    %27 = arith.addf %24, %26 : vector<2x128xf32>
    %28 = arith.truncf %27 : vector<2x128xf32> to vector<2x128xbf16>
    %c0_22 = arith.constant 0 : index
    %c0_23 = arith.constant 0 : index
    %29 = vector.load %arg8[%c0_22, %c0_23] : memref<2x128xbf16, #tpu.memory_space<vmem>>, vector<2x128xbf16>
    tpu.vector_store %arg8[%c0_22, %c0_23], %28 {strides = array<i32>} : memref<2x128xbf16, #tpu.memory_space<vmem>>, vector<2x128xbf16>,
    return
  }
  func.func @transform_0(%arg0: i32) -> (i32, i32) {
    %c0_i32 = arith.constant 0 : i32
    %c0_i32_0 = arith.constant 0 : i32
    return %arg0, %c0_i32 : i32, i32
  }
  func.func @transform_1(%arg0: i32) -> (i32, i32) {
    %c0_i32 = arith.constant 0 : i32
    %c0_i32_0 = arith.constant 0 : i32
    %c0_i32_1 = arith.constant 0 : i32
    return %c0_i32, %c0_i32_0 : i32, i32
  }
  func.func @transform_2(%arg0: i32) -> (i32, i32) {
    %c0_i32 = arith.constant 0 : i32
    %c0_i32_0 = arith.constant 0 : i32
    %c0_i32_1 = arith.constant 0 : i32
    return %c0_i32, %c0_i32_0 : i32, i32
  }
  func.func @transform_3(%arg0: i32) -> (i32, i32) {
    %c0_i32 = arith.constant 0 : i32
    %c0_i32_0 = arith.constant 0 : i32
    %c0_i32_1 = arith.constant 0 : i32
    return %c0_i32, %c0_i32_0 : i32, i32
  }
  func.func @transform_4(%arg0: i32) -> (i32, i32) {
    %c0_i32 = arith.constant 0 : i32
    %c0_i32_0 = arith.constant 0 : i32
    %c0_i32_1 = arith.constant 0 : i32
    return %c0_i32, %c0_i32_0 : i32, i32
  }
  func.func @transform_5(%arg0: i32) -> (i32, i32) {
    %c0_i32 = arith.constant 0 : i32
    %c0_i32_0 = arith.constant 0 : i32
    %c0_i32_1 = arith.constant 0 : i32
    return %c0_i32, %c0_i32_0 : i32, i32
  }
  func.func @transform_6(%arg0: i32) -> (i32, i32) {
    %c0_i32 = arith.constant 0 : i32
    %c0_i32_0 = arith.constant 0 : i32
    %c0_i32_1 = arith.constant 0 : i32
    return %c0_i32, %c0_i32_0 : i32, i32
  }
  func.func @transform_7(%arg0: i32) -> (i32, i32) {
    %c0_i32 = arith.constant 0 : i32
    %c0_i32_0 = arith.constant 0 : i32
    return %arg0, %c0_i32 : i32, i32
  }
}

</mosaic_0001>

<bundles_post_ra>
// kernel: eq.8
= control target key start
LH: loop header
LB: loop body
LE: loop exit
PB: predicated region body
PF: predicated region fallthrough
CT: control target
= control target key end

     0   :  { %s13_s8 = smov 3  ;;  %s38_s9 = smov 96   ;;  %vm4_vm0 = vcmask 261120   ;;  %vm10_vm1 = vcmask 1048320   ;;  %vm17_vm2 = vcmask 785920   ;;  %vm24_vm3 = vcmask 523520   ;;  %s66_s0 = inlined_call_operand.vmem [shape: s32[7,32], index: 0, kind: input, shape index: {}]   ;;  %s67_s1 = inlined_call_operand.vmem [shape: s32[224], index: 1, kind: output, shape index: {}]  }
   0x1   :  { %v32_v0 = vld [vmem:[%s66_s0 + $0x3] sm:$0x1]   ;;  %s20_s10 = smov 3  ;;  %v33_v1 = vld [vmem:[%s66_s0 + $0x2] ss:$4 sm:%s13_s8]   ;;  %s2_s15 = smov 3 }
   0x2   :  { %8 = vrot.lane.b32.xlu0 %v32_v0, %s38_s9  ;;  %v34_v2 = vld [vmem:[%s66_s0 + $0x1] ss:$4 sm:%s20_s10]   ;;  %s39_s16 = smov 32  }
   0x3   :  { %22 = vrot.lane.b32.xlu1 %v34_v2, %s39_s16  ;;  %v3_v3 = vld [vmem:[%s66_s0] ss:$4 sm:%s2_s15]   ;;  %s40_s0 = smov 64  }
   0x4   :  { %5 = vst.msk [vmem:[#allocation0] sm:$0x3] %vm4_vm0, %v3_v3  }
   0x6   :  { %15 = vrot.lane.b32.xlu0 %v33_v1, %s40_s0 }
  0x74   :  { %v9_v4 = vpop.permute.xlu0 %8  }
  0x75   :  { %11 = vst.msk [vmem:[#allocation0] sm:$0x1] %vm10_vm1, %v9_v4   ;;  %v23_v5 = vpop.permute.xlu1 %22  }
  0x78   :  { %v16_v6 = vpop.permute.xlu0 %15  }
  0x79   :  { %18 = vst.msk [vmem:[#allocation0] sm:$0x3] %vm17_vm2, %v16_v6  }
  0x7a   :  { %25 = vst.msk [vmem:[#allocation0] sm:$0x3] %vm24_vm3, %v23_v5  }
  0x81   :  { %v29_v7 = vld [vmem:[#allocation0] sm:$0x3] }
  0x82   :  { %31 = vst [vmem:[%s67_s1] sm:$0x3] %v29_v7 }

// kernel: style_predictor_forward.1
= control target key start
LH: loop header
LB: loop body
LE: loop exit
PB: predicated region body
PF: predicated region fallthrough
CT: control target
= control target key end

     0   :  { %v758_v0 = vmov 0.0|0.0   ;;  %v759_v4 = vmov 1983009808   ;;  %v61_v6 = vlaneseq  ;;  %vm67_vm0 = vcmask 785408   ;;  %s1013_s1 = inlined_call_operand.vmem [shape: f32[224,7], index: 1, kind: input, shape index: {}]   ;;  %s1014_s0 = inlined_call_operand.vmem [shape: bf16[2,224], index: 0, kind: input, shape index: {}]   ;;  %s1015_s2 = inlined_call_operand.vmem [shape: f32[7,224], index: 2, kind: input, shape index: {}]   ;;  %s1016_s5 = inlined_call_operand.vmem [shape: bf16[224,128], index: 5, kind: input, shape index: {}]   ;;  %s1017_s3 = inlined_call_operand.vmem [shape: f32[1,224], index: 3, kind: input, shape index: {}]   ;;  %s1018_s4 = inlined_call_operand.vmem [shape: f32[1,224], index: 4, kind: input, shape index: {}]   ;;  %s1019_s6 = inlined_call_operand.vmem [shape: f32[1,128], index: 6, kind: input, shape index: {}]   ;;  %s1020_s7 = inlined_call_operand.vmem [shape: bf16[2,128], index: 7, kind: output, shape index: {}]  }
   0x1   :  { %652 = vmatprep.subr.bf16.mxu0 %v758_v0  ;;  %v29_v1 = vld [vmem:[%s1013_s1] sm:$0xff]  ;;  %v30_v2 = vld [vmem:[%s1013_s1 + $0x8] sm:$0xff]  ;;  %v31_v3 = vld [vmem:[%s1013_s1 + $0x10] sm:$0xff]  ;;  %v59_v5 = vunpack.c.l.s4 %v759_v4  ;;  %694 = vmatprep.subr.bf16.mxu1 %v758_v0  ;;  %vm146_vm1 = vcmask 1046528   ;;  %v760_v55 = vmov 0.0   ;;  %vm142_vm2 = vcmask 56320  }
   0x2   :  { %v653_v7 = vpack.c.bf16 %v30_v2, %v29_v1  ;;  %v32_v8 = vld [vmem:[%s1013_s1 + $0x18] sm:$0xff]  ;;  %v33_v10 = vld [vmem:[%s1013_s1 + $0x20] sm:$0xff]  ;;  %v34_v11 = vld [vmem:[%s1013_s1 + $0x28] sm:$0xff]  ;;  %v823_v13 = vshrl.u32 %v61_v6, 7  ;;  %v761_v2 = vmov 0  }
   0x3   :  { %v656_v9 = vpack.c.bf16 %v32_v8, %v31_v3  ;;  %v60_v12 = vunpack.c.0.s8 %v59_v5  ;;  %v659_v14 = vpack.c.bf16 %v34_v11, %v33_v10  ;;  %v35_v15 = vld [vmem:[%s1013_s1 + $0x30] sm:$0xff]  ;;  %v36_v16 = vld [vmem:[%s1013_s1 + $0x38] sm:$0xff]  ;;  %v840_v18 = vld [vmem:[%s1014_s0] sm:$0x3] }
   0x4   :  { %654 = vmatpush1.bf16.msra.mxu0 %v653_v7  ;;  %696 = vmatpush1.bf16.msra.mxu1 %v653_v7  ;;  %v28_v19 = vunpack.c.l.bf16 %v840_v18  ;;  %v662_v20 = vpack.c.bf16 %v36_v16, %v35_v15  ;;  %v37_v21 = vld [vmem:[%s1013_s1 + $0x40] sm:$0xff]  ;;  %v38_v22 = vld [vmem:[%s1013_s1 + $0x48] sm:$0xff]  ;;  %v39_v26 = vld [vmem:[%s1013_s1 + $0x50] sm:$0xff] }
   0x5   :  { %655 = vmatprep.subr.bf16.mxu0 %v758_v0  ;;  %697 = vmatprep.subr.bf16.mxu1 %v758_v0  ;;  %v834_v17 = vsub.s32 %v60_v12, %v823_v13  ;;  %v665_v25 = vpack.c.bf16 %v38_v22, %v37_v21  ;;  %v40_v27 = vld [vmem:[%s1013_s1 + $0x58] sm:$0xff]  ;;  %v41_v29 = vld [vmem:[%s1013_s1 + $0x60] sm:$0xff]  ;;  %v42_v30 = vld [vmem:[%s1013_s1 + $0x68] sm:$0xff] }
   0x6   :  { %v668_v28 = vpack.c.bf16 %v40_v27, %v39_v26  ;;  %v671_v31 = vpack.c.bf16 %v42_v30, %v41_v29  ;;  %v43_v32 = vld [vmem:[%s1013_s1 + $0x70] sm:$0xff]  ;;  %v44_v33 = vld [vmem:[%s1013_s1 + $0x78] sm:$0xff]  ;;  %v45_v35 = vld [vmem:[%s1013_s1 + $0x80] sm:$0xff]  ;;  %v415_v26 = vsub.s32 1, %v823_v13 }
   0x7   :  { %v853_v23 = vrot.slane %v28_v19, %v834_v17  ;;  %v674_v34 = vpack.c.bf16 %v44_v33, %v43_v32  ;;  %v46_v36 = vld [vmem:[%s1013_s1 + $0x88] sm:$0xff]  ;;  %v47_v38 = vld [vmem:[%s1013_s1 + $0x90] sm:$0xff]  ;;  %v48_v39 = vld [vmem:[%s1013_s1 + $0x98] sm:$0xff] }
   0x8   :  { %657 = vmatpush1.bf16.msra.mxu0 %v656_v9  ;;  %699 = vmatpush1.bf16.msra.mxu1 %v656_v9  ;;  %v677_v37 = vpack.c.bf16 %v46_v36, %v45_v35  ;;  %v680_v40 = vpack.c.bf16 %v48_v39, %v47_v38  ;;  %v49_v41 = vld [vmem:[%s1013_s1 + $0xa0] sm:$0xff]  ;;  %v50_v42 = vld [vmem:[%s1013_s1 + $0xa8] sm:$0xff]  ;;  %v51_v44 = vld [vmem:[%s1013_s1 + $0xb0] sm:$0xff] }
   0x9   :  { %658 = vmatprep.subr.bf16.mxu0 %v758_v0  ;;  %700 = vmatprep.subr.bf16.mxu1 %v758_v0  ;;  %v65_v24 = vcombine.high %v853_v23, %v853_v23  ;;  %v683_v43 = vpack.c.bf16 %v50_v42, %v49_v41  ;;  %v52_v45 = vld [vmem:[%s1013_s1 + $0xb8] sm:$0xff]  ;;  %v53_v47 = vld [vmem:[%s1013_s1 + $0xc0] sm:$0xff]  ;;  %v54_v48 = vld [vmem:[%s1013_s1 + $0xc8] sm:$0xff] }
   0xa   :  { %v686_v46 = vpack.c.bf16 %v52_v45, %v51_v44  ;;  %v689_v49 = vpack.c.bf16 %v54_v48, %v53_v47  ;;  %v55_v50 = vld [vmem:[%s1013_s1 + $0xd0] sm:$0xff]  ;;  %v56_v51 = vld [vmem:[%s1013_s1 + $0xd8] sm:$0xff]  ;;  %v141_v53 = vld [vmem:[%s1015_s2 + $0x8] sm:$0x7f] }
   0xb   :  { %628 = vmatprep.mubr.msk.f32.mxu0 %vm67_vm0, %v65_v24  ;;  %v692_v52 = vpack.c.bf16 %v56_v51, %v55_v50  ;;  %v140_v54 = vld [vmem:[%s1015_s2] sm:$0x7f]  ;;  %v741_v4 = vld [vmem:[%s1016_s5 + $0x8] sm:$0xff]   ;;  %v742_v5 = vld [vmem:[%s1016_s5 + $0x10] sm:$0xff]  }
   0xc   :  { %660 = vmatpush1.bf16.msra.mxu0 %v659_v14  ;;  %702 = vmatpush1.bf16.msra.mxu1 %v659_v14  ;;  %v740_v3 = vld [vmem:[%s1016_s5] sm:$0xff]   ;;  %v743_v6 = vld [vmem:[%s1016_s5 + $0x18] sm:$0xff]   ;;  %v745_v8 = vld [vmem:[%s1016_s5 + $0x28] sm:$0xff]  }
   0xd   :  { %661 = vmatprep.subr.bf16.mxu0 %v758_v0  ;;  %703 = vmatprep.subr.bf16.mxu1 %v758_v0  ;;  %v744_v7 = vld [vmem:[%s1016_s5 + $0x20] sm:$0xff]   ;;  %v746_v11 = vld [vmem:[%s1016_s5 + $0x30] sm:$0xff]   ;;  %v747_v12 = vld [vmem:[%s1016_s5 + $0x38] sm:$0xff]  }
   0xe   :  { %v748_v14 = vld [vmem:[%s1016_s5 + $0x40] sm:$0xff]   ;;  %v749_v15 = vld [vmem:[%s1016_s5 + $0x48] sm:$0xff]   ;;  %v750_v16 = vld [vmem:[%s1016_s5 + $0x50] sm:$0xff]  }
   0xf   :  { %v751_v18 = vld [vmem:[%s1016_s5 + $0x58] sm:$0xff]   ;;  %v407_v27 = vld [vmem:[%s1017_s3] sm:$0x3] }
  0x10   :  { %663 = vmatpush1.bf16.msra.mxu0 %v662_v20  ;;  %705 = vmatpush1.bf16.msra.mxu1 %v662_v20  ;;  %v753_v20 = vld [vmem:[%s1016_s5 + $0x68] sm:$0xff]   ;;  %v416_v30 = vrot.slane %v407_v27, %v415_v26  ;;  %v636_v47 = vld [vmem:[%s1019_s6] ss:$0 sm:$0xff] }
  0x11   :  { %664 = vmatprep.subr.bf16.mxu0 %v758_v0  ;;  %706 = vmatprep.subr.bf16.mxu1 %v758_v0 }
  0x14   :  { %666 = vmatpush1.bf16.msra.mxu0 %v665_v25  ;;  %708 = vmatpush1.bf16.msra.mxu1 %v665_v25  ;;  %v411_v25 = vsub.s32 0, %v823_v13 }
  0x15   :  { %667 = vmatprep.subr.bf16.mxu0 %v758_v0  ;;  %709 = vmatprep.subr.bf16.mxu1 %v758_v0 }
  0x16   :  { %v412_v29 = vrot.slane %v407_v27, %v411_v25 }
  0x18   :  { %669 = vmatpush1.bf16.msra.mxu0 %v668_v28  ;;  %711 = vmatpush1.bf16.msra.mxu1 %v668_v28  ;;  %v427_v28 = vld [vmem:[%s1018_s4] sm:$0x3] }
  0x19   :  { %670 = vmatprep.subr.bf16.mxu0 %v758_v0  ;;  %712 = vmatprep.subr.bf16.mxu1 %v758_v0  ;;  %v436_v32 = vrot.slane %v427_v28, %v415_v26 }
  0x1c   :  { %672 = vmatpush1.bf16.msra.mxu0 %v671_v31  ;;  %714 = vmatpush1.bf16.msra.mxu1 %v671_v31  ;;  %v432_v31 = vrot.slane %v427_v28, %v411_v25 }
  0x1d   :  { %673 = vmatprep.subr.bf16.mxu0 %v758_v0  ;;  %715 = vmatprep.subr.bf16.mxu1 %v758_v0 }
  0x20   :  { %675 = vmatpush1.bf16.msra.mxu0 %v674_v34  ;;  %717 = vmatpush1.bf16.msra.mxu1 %v674_v34  ;;  %v417_v34 = vcombine.low %v412_v29, %v416_v30 }
  0x21   :  { %676 = vmatprep.subr.bf16.mxu0 %v758_v0  ;;  %718 = vmatprep.subr.bf16.mxu1 %v758_v0 }
  0x22   :  { %v424_v13 = vrot.slane %v417_v34, %v834_v17 }
  0x24   :  { %678 = vmatpush1.bf16.msra.mxu0 %v677_v37  ;;  %720 = vmatpush1.bf16.msra.mxu1 %v677_v37  ;;  %v437_v37 = vcombine.low %v432_v31, %v436_v32 }
  0x25   :  { %679 = vmatprep.subr.bf16.mxu0 %v758_v0  ;;  %721 = vmatprep.subr.bf16.mxu1 %v758_v0 }
  0x28   :  { %681 = vmatpush1.bf16.msra.mxu0 %v680_v40  ;;  %723 = vmatpush1.bf16.msra.mxu1 %v680_v40  ;;  %v444_v40 = vrot.slane %v437_v37, %v834_v17 }
  0x29   :  { %682 = vmatprep.subr.bf16.mxu0 %v758_v0  ;;  %724 = vmatprep.subr.bf16.mxu1 %v758_v0 }
  0x2c   :  { %684 = vmatpush1.bf16.msra.mxu0 %v683_v43  ;;  %726 = vmatpush1.bf16.msra.mxu1 %v683_v43 }
  0x2d   :  { %685 = vmatprep.subr.bf16.mxu0 %v758_v0  ;;  %727 = vmatprep.subr.bf16.mxu1 %v758_v0 }
  0x30   :  { %687 = vmatpush1.bf16.msra.mxu0 %v686_v46  ;;  %729 = vmatpush1.bf16.msra.mxu1 %v686_v46 }
  0x31   :  { %688 = vmatprep.subr.bf16.mxu0 %v758_v0  ;;  %730 = vmatprep.subr.bf16.mxu1 %v758_v0 }
  0x34   :  { %690 = vmatpush1.bf16.msra.mxu0 %v689_v49  ;;  %732 = vmatpush1.bf16.msra.mxu1 %v689_v49 }
  0x35   :  { %691 = vmatprep.subr.bf16.mxu0 %v758_v0  ;;  %733 = vmatprep.subr.bf16.mxu1 %v758_v0 }
  0x38   :  { %693 = vmatpush1.bf16.msra.mxu0 %v692_v52  ;;  %735 = vmatpush1.bf16.msra.mxu1 %v692_v52 }
  0x39   :  { %629 = vmatprep.subr.msk.mxu0 %vm146_vm1, %v141_v53  ;;  %582 = vmatprep.subr.bf16.mxu1 %v761_v2 }
  0x3b   :  { %135 = vmatmul.mubr.f32.vlgmr.msra.gmra.mrb[0].mxu0 %v853_v23 }
  0x3c   :  { %630 = vmatpush1.msk.msra.mxu0 %vm146_vm1, %v140_v54  ;;  %217 = vmatprep.mubr.f32.mxu0 %v760_v55 }
  0x3d   :  { %633 = vmatprep.subr.msk.mxu0 %vm146_vm1, %v141_v53 }
 0x10e   :  { %v136_v56 = vpop.f32.mrb[0].mxu0 }
 0x10f   :  { %v138_v57 = vpop.f32.mrb[1].mxu0  ;;  %631 = vmatmul.mubr.msk.f32.vlgmr.msra.gmra.mrb[2].mxu0 %vm142_vm2, %v136_v56 }
 0x110   :  { %634 = vmatpush1.msk.msra.mxu0 %vm146_vm1, %v140_v54  ;;  %386 = vmatprep.mubr.f32.mxu0 %v760_v55 }
 0x1e2   :  { %v219_v58 = vpop.f32.mrb[2].mxu0 }
 0x1e3   :  { %v221_v59 = vpop.f32.mrb[3].mxu0 }
 0x1e4   :  { %v226_v60 = vcombine.low %v219_v58, %v221_v59 }
 0x1e6   :  { %v233_v61 = vrot.slane %v226_v60, %v834_v17 }
 0x1e8   :  { %v944_v62 = vsub.f32 %v28_v19, %v233_v61  ;;  %v752_v19 = vld [vmem:[%s1016_s5 + $0x60] sm:$0xff]  }
 0x1ea   :  { %v236_v63 = vmul.f32 %v944_v62, %v944_v62 }
 0x1ec   :  { %v244_v0 = vrot.slane %v236_v63, %v834_v17 }
 0x1ee   :  { %v245_v1 = vcombine.high %v244_v0, %v244_v0 }
 0x1f0   :  { %632 = vmatprep.mubr.msk.f32.mxu1 %vm67_vm0, %v245_v1 }
 0x1f1   :  { %314 = vmatmul.mubr.f32.vlgmr.msra.gmra.mrb[0].mxu1 %v244_v0 }
 0x1f2   :  { %583 = vmatpush1.bf16.msra.mxu1 %v740_v3 }
 0x1f3   :  { %584 = vmatprep.subr.bf16.mxu1 %v761_v2 }
 0x1f6   :  { %585 = vmatpush1.bf16.msra.mxu1 %v741_v4 }
 0x1f7   :  { %586 = vmatprep.subr.bf16.mxu1 %v761_v2 }
 0x1fa   :  { %587 = vmatpush1.bf16.msra.mxu1 %v742_v5 }
 0x1fb   :  { %588 = vmatprep.subr.bf16.mxu1 %v761_v2 }
 0x1fe   :  { %589 = vmatpush1.bf16.msra.mxu1 %v743_v6 }
 0x1ff   :  { %590 = vmatprep.subr.bf16.mxu1 %v761_v2 }
 0x202   :  { %591 = vmatpush1.bf16.msra.mxu1 %v744_v7 }
 0x203   :  { %592 = vmatprep.subr.bf16.mxu1 %v761_v2 }
 0x206   :  { %593 = vmatpush1.bf16.msra.mxu1 %v745_v8 }
 0x207   :  { %594 = vmatprep.subr.bf16.mxu1 %v761_v2 }
 0x20a   :  { %595 = vmatpush1.bf16.msra.mxu1 %v746_v11 }
 0x20b   :  { %596 = vmatprep.subr.bf16.mxu1 %v761_v2 }
 0x20e   :  { %597 = vmatpush1.bf16.msra.mxu1 %v747_v12 }
 0x20f   :  { %598 = vmatprep.subr.bf16.mxu1 %v761_v2 }
 0x212   :  { %599 = vmatpush1.bf16.msra.mxu1 %v748_v14 }
 0x213   :  { %600 = vmatprep.subr.bf16.mxu1 %v761_v2 }
 0x216   :  { %601 = vmatpush1.bf16.msra.mxu1 %v749_v15 }
 0x217   :  { %602 = vmatprep.subr.bf16.mxu1 %v761_v2 }
 0x21a   :  { %603 = vmatpush1.bf16.msra.mxu1 %v750_v16 }
 0x21b   :  { %604 = vmatprep.subr.bf16.mxu1 %v761_v2 }
 0x21e   :  { %605 = vmatpush1.bf16.msra.mxu1 %v751_v18 }
 0x21f   :  { %606 = vmatprep.subr.bf16.mxu1 %v761_v2 }
 0x222   :  { %607 = vmatpush1.bf16.msra.mxu1 %v752_v19 }
 0x223   :  { %608 = vmatprep.subr.bf16.mxu1 %v761_v2 }
 0x226   :  { %609 = vmatpush1.bf16.msra.mxu1 %v753_v20 }
 0x2c4   :  { %v315_v9 = vpop.f32.mrb[0].mxu1 }
 0x2c5   :  { %v317_v10 = vpop.f32.mrb[1].mxu1  ;;  %635 = vmatmul.mubr.msk.f32.vlgmr.msra.gmra.mrb[4].mxu0 %vm142_vm2, %v315_v9 }
 0x398   :  { %v388_v21 = vpop.f32.mrb[4].mxu0 }
 0x399   :  { %v389_v22 = vadd.f32 1e-05, %v388_v21  ;;  %v390_v23 = vpop.f32.mrb[5].mxu0 }
 0x39a   :  { %v391_v24 = vadd.f32 1e-05, %v390_v23 }
 0x39b   :  { %754 = vrsqrt.f32 %v389_v22 }
 0x39c   :  { %756 = vrsqrt.f32 %v391_v24 }
 0x3a5   :  { %v755_v33 = vpop.eup %754 }
 0x3a6   :  { %v757_v35 = vpop.eup %756 }
 0x3a7   :  { %v397_v36 = vcombine.low %v755_v33, %v757_v35 }
 0x3a9   :  { %v404_v38 = vrot.slane %v397_v36, %v834_v17 }
 0x3ab   :  { %v406_v39 = vmul.f32 %v404_v38, %v944_v62 }
 0x3ad   :  { %v426_v41 = vmul.f32 %v424_v13, %v406_v39 }
 0x3af   :  { %v446_v42 = vadd.f32 %v444_v40, %v426_v41 }
 0x3b1   :  { %v454_v43 = vrot.slane %v446_v42, %v834_v17 }
 0x3b3   :  { %v455_v44 = vcombine.high %v454_v43, %v454_v43  ;;  %v458_v46 = vpack.c.bf16 %v454_v43, %v454_v43 }
 0x3b5   :  { %v459_v45 = vpack.c.bf16 %v455_v44, %v455_v44 }
 0x3b7   :  { %651 = vmatprep.mubr.msk.bf16.mxu1 %vm67_vm0, %v459_v45 }
 0x3b8   :  { %615 = vmatmul.mubr.bf16.vlgmr.msra.gmra.mrb[4].mxu1 %v458_v46 }
 0x48b   :  { %v616_v48 = vpop.f32.mrb[4].mxu1 }
 0x48c   :  { %v617_v49 = vadd.f32 %v636_v47, %v616_v48  ;;  %v618_v50 = vpop.f32.mrb[5].mxu1 }
 0x48d   :  { %v619_v51 = vpop.f32.mrb[6].mxu1 }
 0x48e   :  { %v622_v52 = vpack.c.bf16 %v617_v49, %v617_v49  ;;  %v620_v53 = vpop.f32.mrb[7].mxu1 }
 0x490   :  { %623 = vst [vmem:[%s1020_s7] sm:$0x1] %v622_v52 }

</bundles_post_ra>
